<compile_context>
chip_gen: v6e
topology: v6e:2x2x1
jax: 0.10.0
libtpu: 0.0.40
codegen_flags: <defaults>
</compile_context>

<pallas_src>
import functools

import jax
import jax.numpy as jnp
from jax.experimental import pallas as pl
from jax.experimental.pallas import tpu as pltpu

_MIB = 1024 * 1024


# ----------------------------------------------------------------------------
# Kernel: elementwise add of the (batch-broadcast) PE tile onto the x tile.
# Shape-agnostic: works for both the 3-D (tb, tS, D) path and the flattened
# 2-D (B, chunk) path; pe_ref always has a leading dim of 1.
# ----------------------------------------------------------------------------
def _pe_add_kernel(x_ref, pe_ref, o_ref):
    o_ref[...] = (x_ref[...].astype(jnp.float32)
                  + pe_ref[...].astype(jnp.float32)).astype(o_ref.dtype)


# ----------------------------------------------------------------------------
# PE table, identical to the PyTorch buffer, cached across forward calls.
# ----------------------------------------------------------------------------
@functools.lru_cache(maxsize=32)
def _make_pe_cached(seq_len, d_model, dtype_name):
    position = jnp.arange(seq_len, dtype=jnp.float32)[:, None]              # (S, 1)
    div_term = jnp.exp(jnp.arange(0, d_model, 2, dtype=jnp.float32)
                       * (-jnp.log(10000.0) / d_model))                     # (D/2,)
    ang = position * div_term                                               # (S, D/2)
    pe = jnp.zeros((seq_len, d_model), dtype=jnp.float32)
    pe = pe.at[:, 0::2].set(jnp.sin(ang))
    pe = pe.at[:, 1::2].set(jnp.cos(ang))
    pe = pe.astype(dtype_name)[None, :, :]                                  # (1, S, D)
    return jax.block_until_ready(pe)


# ----------------------------------------------------------------------------
# Generation-aware VMEM limit and block-size budget.
# ----------------------------------------------------------------------------
def _vmem_limit_bytes():
    try:
        cap = pltpu.get_tpu_info().vmem_capacity_bytes
        return max(32 * _MIB, (int(cap) * 3) // 4)      # 48 MiB on v7x, 96 on v5e/v6e
    except Exception:
        return 48 * _MIB                                 # safe everywhere


def _round_down(x, m):
    return (x // m) * m


def _round_up(x, m):
    return ((x + m - 1) // m) * m


# ----------------------------------------------------------------------------
# Tile choosers (cdiv grids; ragged last blocks are fine).
# ----------------------------------------------------------------------------
def _choose_tiles_3d(B, S, D, itemsize, target_bytes):
    """Jointly choose (tS, tb) for (tb, tS, D) blocks of ~target_bytes."""
    align = max(8, 32 // max(1, itemsize))          # 8 f32, 16 bf16, 32 i8
    row_bytes = D * itemsize
    seq_bytes = S * row_bytes

    if seq_bytes <= target_bytes:
        tS = S
        tb = max(1, min(B, target_bytes // max(1, seq_bytes)))
    else:
        tb = 1
        tS = min(_round_up(S, align),
                 max(align, _round_down(target_bytes // row_bytes, align)))

    def total_steps():
        return pl.cdiv(S, tS) * pl.cdiv(B, tb)

    def shrink_once(floor_bytes):
        nonlocal tS, tb
        if tb > 1:                                   # prefer shrinking batch tile
            new_tb = max(1, tb // 2)
            if new_tb * tS * row_bytes >= floor_bytes:
                tb = new_tb
                return True
        if tS > align:
            new_tS = max(align, _round_down(pl.cdiv(tS, 2), align))
            if new_tS < tS and new_tS * tb * row_bytes >= floor_bytes:
                tS = new_tS
                return True
        return False

    # v7x megacore: >=2 grid steps (ideally >=8) while blocks stay >= ~2 MiB;
    # only drop below that floor to reach the bare minimum of 2 steps.
    for want, floor_bytes in ((8, 2 * _MIB), (2, 0)):
        while total_steps() < want and shrink_once(floor_bytes):
            pass
    return tS, tb


def _choose_chunk_2d(B, total_lanes, itemsize, target_bytes):
    """Chunk of the flattened (S*D) axis for (B, chunk) blocks (128-aligned)."""
    if B * total_lanes * itemsize <= target_bytes:
        chunk = total_lanes
    else:
        chunk = max(128, _round_down(target_bytes // max(1, B * itemsize), 128))
        chunk = min(chunk, _round_up(total_lanes, 128))

    def steps():
        return pl.cdiv(total_lanes, chunk)

    for want, floor_bytes in ((8, 2 * _MIB), (2, 0)):
        while steps() < want and chunk > 128:
            new_chunk = max(128, _round_down(pl.cdiv(chunk, 2), 128))
            if new_chunk >= chunk or new_chunk * B * itemsize < floor_bytes:
                break
            chunk = new_chunk

    if chunk >= total_lanes:
        chunk = total_lanes                          # full-axis block (always legal)
    return chunk


# ----------------------------------------------------------------------------
# Public wrapper — forward pass of PositionalEncoding.
# ----------------------------------------------------------------------------
def positional_encoding_add(x, max_len=5000, *, donate_input=False):
    """x: (batch, seq_len, d_model) -> x + pe[:, :seq_len]."""
    B, S, D = x.shape
    assert S <= max_len, "seq_len exceeds max_len of the PE buffer"
    assert D % 2 == 0, "d_model must be even (same restriction as the PyTorch module)"

    itemsize = jnp.dtype(x.dtype).itemsize
    pe = _make_pe_cached(S, D, jnp.dtype(x.dtype).name)          # (1, S, D), x.dtype

    vmem_limit = _vmem_limit_bytes()
    # ~6x the x-block lives in VMEM (x/out double-buffers + pe); leave headroom.
    target_bytes = min(8 * _MIB, max(_MIB, vmem_limit // 6))

    alias_kwargs = {"input_output_aliases": {0: 0}} if donate_input else {}

    if D >= 128 and D % 128 == 0:
        # Lane-dense feature dim: tile (batch, seq) with the pe block indexed
        # only by the seq step so it stays VMEM-resident across the batch sweep
        # (batch is the innermost grid axis).
        tS, tb = _choose_tiles_3d(B, S, D, itemsize, target_bytes)
        grid = (pl.cdiv(S, tS), pl.cdiv(B, tb))
        return pl.pallas_call(
            _pe_add_kernel,
            out_shape=jax.ShapeDtypeStruct((B, S, D), x.dtype),
            grid_spec=pltpu.PrefetchScalarGridSpec(
                num_scalar_prefetch=0,
                grid=grid,
                in_specs=[
                    pl.BlockSpec((tb, tS, D), lambda s, b: (b, s, 0)),   # x
                    pl.BlockSpec((1, tS, D), lambda s, b: (0, s, 0)),    # pe
                ],
                out_specs=pl.BlockSpec((tb, tS, D), lambda s, b: (b, s, 0)),
            ),
            compiler_params=pltpu.CompilerParams(
                dimension_semantics=("parallel", "parallel"),
                vmem_limit_bytes=vmem_limit,
            ),
            **alias_kwargs,
        )(x, pe)

    # Lane-sparse d_model (< 128 or not a multiple of 128): flatten seq*d_model
    # into one lane-dense axis so stores are full-width vst, not masked vst.msk.
    total = S * D
    chunk = _choose_chunk_2d(B, total, itemsize, target_bytes)
    x2 = x.reshape(B, total)
    pe2 = pe.reshape(1, total)
    out2 = pl.pallas_call(
        _pe_add_kernel,
        out_shape=jax.ShapeDtypeStruct((B, total), x.dtype),
        grid_spec=pltpu.PrefetchScalarGridSpec(
            num_scalar_prefetch=0,
            grid=(pl.cdiv(total, chunk),),
            in_specs=[
                pl.BlockSpec((B, chunk), lambda i: (0, i)),   # x  (flattened)
                pl.BlockSpec((1, chunk), lambda i: (0, i)),   # pe (flattened)
            ],
            out_specs=pl.BlockSpec((B, chunk), lambda i: (0, i)),
        ),
        compiler_params=pltpu.CompilerParams(
            dimension_semantics=("parallel",),
            vmem_limit_bytes=vmem_limit,
        ),
        **alias_kwargs,
    )(x2, pe2)
    return out2.reshape(B, S, D)


# ----------------------------------------------------------------------------
# Pure-JAX reference matching the PyTorch module exactly.
# ----------------------------------------------------------------------------
def _reference(x):
    _, S, D = x.shape
    pe = _make_pe_cached(S, D, "float32")
    return (x.astype(jnp.float32) + pe).astype(x.dtype)


if __name__ == "__main__":
    key = jax.random.PRNGKey(0)

    # Primary small example consistent with the module: batch=2, seq=8, d_model=32.
    x = jax.random.normal(key, (2, 8, 32), dtype=jnp.float32)
    out = jax.block_until_ready(positional_encoding_add(x))
    assert out.shape == x.shape and out.dtype == x.dtype
    assert jnp.allclose(out, _reference(x), atol=1e-5, rtol=1e-5)

    # Exercise the lane-dense 3-D path (d_model multiple of 128).
    xa = jax.random.normal(jax.random.PRNGKey(1), (2, 16, 128), dtype=jnp.float32)
    oa = jax.block_until_ready(positional_encoding_add(xa))
    assert jnp.allclose(oa, _reference(xa), atol=1e-5, rtol=1e-5)

    # Exercise a ragged (non-divisor) flattened chunk in the 2-D path.
    xb = jax.random.normal(jax.random.PRNGKey(2), (2, 7, 24), dtype=jnp.float32)
    ob = jax.block_until_ready(positional_encoding_add(xb))
    assert jnp.allclose(ob, _reference(xb), atol=1e-5, rtol=1e-5)

    print("KERNEL_OK")
</pallas_src>

<mosaic_0001>
module attributes {stable_mosaic.version = 11 : i64} {
  func.func @_pe_add_kernel(%arg0: i32, %arg1: memref<2x128xf32, #tpu.memory_space<vmem>>, %arg2: memref<1x128xf32, #tpu.memory_space<vmem>>, %arg3: memref<2x128xf32, #tpu.memory_space<vmem>>) attributes {dimension_semantics = [#tpu.dimension_semantics<parallel>], iteration_bounds = array<i64: 2>, scalar_prefetch = 0 : i64, scratch_operands = 0 : i64, tpu.core_type = #tpu.core_type<tc>, window_params = [{transform_indices = @transform_0, window_bounds = array<i64: 2, 128>}, {transform_indices = @transform_1, window_bounds = array<i64: 1, 128>}, {transform_indices = @transform_2, window_bounds = array<i64: 2, 128>}]} {
    %c0 = arith.constant 0 : index
    %c0_0 = arith.constant 0 : index
    %0 = vector.load %arg1[%c0, %c0_0] : memref<2x128xf32, #tpu.memory_space<vmem>>, vector<2x128xf32>
    %c0_1 = arith.constant 0 : index
    %c0_2 = arith.constant 0 : index
    %1 = vector.load %arg2[%c0_1, %c0_2] : memref<1x128xf32, #tpu.memory_space<vmem>>, vector<1x128xf32>
    %2 = vector.broadcast %1 : vector<1x128xf32> to vector<2x128xf32>
    %3 = arith.addf %0, %2 : vector<2x128xf32>
    %c0_3 = arith.constant 0 : index
    %c0_4 = arith.constant 0 : index
    %4 = vector.load %arg3[%c0_3, %c0_4] : memref<2x128xf32, #tpu.memory_space<vmem>>, vector<2x128xf32>
    tpu.vector_store %arg3[%c0_3, %c0_4], %3 {strides = array<i32>} : memref<2x128xf32, #tpu.memory_space<vmem>>, vector<2x128xf32>,
    return
  }
  func.func @transform_0(%arg0: i32) -> (i32, i32) {
    %c0_i32 = arith.constant 0 : i32
    %c0_i32_0 = arith.constant 0 : i32
    return %c0_i32, %arg0 : i32, i32
  }
  func.func @transform_1(%arg0: i32) -> (i32, i32) {
    %c0_i32 = arith.constant 0 : i32
    %c0_i32_0 = arith.constant 0 : i32
    return %c0_i32, %arg0 : i32, i32
  }
  func.func @transform_2(%arg0: i32) -> (i32, i32) {
    %c0_i32 = arith.constant 0 : i32
    %c0_i32_0 = arith.constant 0 : i32
    return %c0_i32, %arg0 : i32, i32
  }
}

</mosaic_0001>

<bundles_post_ra>
// kernel: tpu_custom_call.1
= control target key start
LH: loop header
LB: loop body
LE: loop exit
PB: predicated region body
PF: predicated region fallthrough
CT: control target
= control target key end

     0   :  { %7 = vsyncpa [#allocation3], 0  ;;  %s705_s0 = inlined_call_operand.hbm [shape: f32[2,256], index: 0, kind: input, shape index: {}]   ;;  %s706_s1 = inlined_call_operand.hbm [shape: f32[1,256], index: 1, kind: input, shape index: {}]   ;;  %s707_s2 = inlined_call_operand.hbm [shape: f32[2,256], index: 2, kind: output, shape index: {}]  }
   0x1   :  { %9 = vsyncpa [#allocation3 + $0x1], 0 }
   0x2   :  { %10 = vsyncpa [#allocation6], 0 }
   0x3   :  { %12 = vsyncpa [#allocation6 + $0x1], 0 }
   0x4   :  { %13 = vsyncpa [#allocation4], 0 }
   0x5   :  { %15 = vsyncpa [#allocation4 + $0x1], 0  ;;  %s516_s9 = smov 0   ;;  %s518_s10 = smov 0  }
   0x6   :  { %s520_s11 = smov 0   ;;  %s522_s12 = smov 0  }
   0x7 LB: > { %s537_s13 = sadd.s32 4294967295, %s496_s12   ;;  %s307_s14 = sadd.s32 4294967294, %s496_s12   ;;  %s496_s12 = sphi %s522_s12, %s726_s12   ;;  %s492_s11 = sphi %s520_s11, %s725_s11   ;;  %s488_s10 = sphi %s518_s10, %s724_s10   ;;  %s484_s9 = sphi %s516_s9, %s723_s9  }
   0x8   : > { %s541_s15 = sadd.s32 1, %s496_s12   ;;  %s28_s16 = sadd.s32 1, %s492_s11 }
   0x9   : > { %s25_s17 = ssub.s32 %s496_s12, %s541_s15  ;;  %p35_p0 = scmp.ne.s32.totalorder %s492_s11, %s488_s10 }
   0xa   : > { %p26_p1 = scmp.eq.s32.totalorder %s25_s17, 0  ;;  %p36_p2 = scmp.eq.s32.totalorder %s496_s12, 0 }
   0xb   : > { %p41_p3 = scmp.ne.s32.totalorder %s488_s10, %s484_s9  ;;  %p42_p4 = scmp.eq.s32.totalorder %s537_s13, 0 }
   0xc   : > { %s553_s18 = scalar_select %p26_p1, %s492_s11, %s28_s16  }
   0xd   : > { %p555_p5 = por %p36_p2, %p35_p0  ;;  %p559_p6 = por %p42_p4, %p41_p3 }
   0xe   : > { %p91_p7 = scmp.eq.s32.totalorder %s537_s13, 1  ;;  %p97_p8 = scmp.eq.s32.totalorder %s307_s14, 1 }
   0xf   : > { %s711_s20 = scalar_select %p559_p6, 1, 0 }
  0x10   : > { %p338_p10 = scmp.lt.s32.totalorder %s496_s12, 2  ;;  %p566_p11 = por %p91_p7, %p35_p0 }
  0x11   : > { %p570_p12 = por %p97_p8, %p41_p3  ;;  %s575_s23 = sand.u32 1, %s492_s11  }
  0x12   : > { %s712_s21 = scalar_select %p566_p11, 1, 0 }
  0x13   : > { %s713_s22 = scalar_select %p570_p12, 1, 0 }
  0x14   : > { %s311_s24 = sshll.u32 %s496_s12, 5  ;;  %s310_s25 = sshll.u32 %s575_s23, 1 }
  0x15   : > { %s582_s28 = scalar_lea.hbm %s705_s0, %s311_s24  ;;  %s121_s29 = scalar_lea.vmem [#allocation2], %s310_s25 }
  0x16   : > { %s128_s30 = sshll.u32 %s121_s29, 4  ;;  %p586_p13 = pnand %p338_p10, %p555_p5  ;;  %s590_s30 = int_to_ptr.vmem [resolvable:$true] %s128_s30 }
  0x17   : > { %s118_s4 = scalar_lea.sflag [#allocation3], %s575_s23  ;;  %s372_s5 = scalar_lea.hbm %s582_s28, 32 }
  0x18   : > { %p373_p2 = scmp.ne.s32.totalorder %s582_s28, %s372_s5  ;;  %p374_p3 = pneg %p586_p13 }
  0x19   : > { %s377_s8 = scalar_lea.hbm %s705_s0, 64  ;;  %p378_p5 = scmp.lt.s32.totalorder %s582_s28, %s705_s0 }
  0x1a   : > { %p375_p4 = pnand %p374_p3, %p373_p2  ;;  %p379_p8 = scmp.lt.s32.totalorder %s377_s8, %s372_s5 }
  0x1c   : > { %p376_p7 = pneg %p375_p4  ;;  %p380_p10 = por %p379_p8, %p378_p5 }
  0x1e   : > { %p381_p9 = pnand %p380_p10, %p376_p7 }
  0x20   : > { %384 = shalt.err (!%p381_p9)
}
  0x21   : > { %s385_s17 = scalar_lea.vmem %s590_s30, 32  ;;  %s498_s19 = smov [#allocation2]  }
  0x22   : > { %p386_p0 = scmp.ne.s32.totalorder %s590_s30, %s385_s17  ;;  %s390_s24 = sshll.u32 %s498_s19, 4  ;;  %s391_s24 = int_to_ptr.vmem [resolvable:$false] %s390_s24 }
  0x23   : > { %s392_s25 = scalar_lea.vmem %s391_s24, 64  ;;  %p393_p1 = scmp.lt.s32.totalorder %s590_s30, %s391_s24 }
  0x24   : > { %p388_p2 = pnand %p386_p0, %p374_p3  ;;  %p394_p12 = scmp.lt.s32.totalorder %s392_s25, %s385_s17 }
  0x26   : > { %p389_p4 = pneg %p388_p2  ;;  %p395_p11 = por %p394_p12, %p393_p1 }
  0x28   : > { %p396_p5 = pnand %p395_p11, %p389_p4 }
  0x2a   : > { %399 = shalt.err (!%p396_p5)
}
  0x2b   : > { %330 = dma.hbm_to_vmem [thread:$0]  (!%p586_p13), %s582_s28, 32, %s590_s30, %s118_s4  }
  0x2c   : > { %p715_p9 = scmp.lt.s32.totalorder %s496_s12, 3  ;;  %p716_p0 = scmp.ge.s32.totalorder %s496_s12, 1 }
  0x2d   : > { %s312_s27 = sshll.u32 %s496_s12, 4  ;;  %s138_s7 = scalar_lea.vmem [#allocation5], %s575_s23 }
  0x2e   : > { %p623_p7 = pnand %p716_p0, %p715_p9  ;;  %s631_s6 = scalar_lea.hbm %s706_s1, %s312_s27 }
  0x2f   : > { %s145_s8 = sshll.u32 %s138_s7, 4  ;;  %s136_s14 = scalar_lea.sflag [#allocation6], %s575_s23  ;;  %s146_s8 = int_to_ptr.vmem [resolvable:$true] %s145_s8 }
  0x30   : > { %s717_s26 = scalar_select %p623_p7, 1, 0 }
  0x31   : > { %s400_s28 = scalar_lea.hbm %s631_s6, 16  ;;  %s405_s16 = scalar_lea.hbm %s706_s1, 32 }
  0x32   : > { %p401_p11 = scmp.ne.s32.totalorder %s631_s6, %s400_s28  ;;  %p406_p8 = scmp.lt.s32.totalorder %s631_s6, %s706_s1 }
  0x33   : > { %p407_p10 = scmp.lt.s32.totalorder %s405_s16, %s400_s28 }
  0x34   : > { %p403_p12 = pnand %p401_p11, %p374_p3 }
  0x35   : > { %p408_p2 = por %p407_p10, %p406_p8 }
  0x36   : > { %p404_p1 = pneg %p403_p12 }
  0x38   : > { %p409_p4 = pnand %p408_p2, %p404_p1 }
  0x3a   : > { %412 = shalt.err (!%p409_p4)
}
  0x3b   : > { %s413_s24 = scalar_lea.vmem %s146_s8, 16  ;;  %s499_s23 = smov [#allocation5]  }
  0x3c   : > { %p414_p5 = scmp.ne.s32.totalorder %s146_s8, %s413_s24  ;;  %s418_s25 = sshll.u32 %s499_s23, 4  ;;  %s419_s25 = int_to_ptr.vmem [resolvable:$false] %s418_s25 }
  0x3d   : > { %s420_s27 = scalar_lea.vmem %s419_s25, 32  ;;  %p421_p11 = scmp.lt.s32.totalorder %s146_s8, %s419_s25 }
  0x3e   : > { %p416_p9 = pnand %p414_p5, %p374_p3  ;;  %p422_p12 = scmp.lt.s32.totalorder %s420_s27, %s413_s24 }
  0x40   : > { %p417_p0 = pneg %p416_p9  ;;  %p423_p6 = por %p422_p12, %p421_p11 }
  0x42   : > { %p424_p7 = pnand %p423_p6, %p417_p0 }
  0x44   : > { %427 = shalt.err (!%p424_p7)
}
  0x45   : > { %333 = dma.hbm_to_vmem [thread:$0]  (!%p586_p13), %s631_s6, 16, %s146_s8, %s136_s14  }
  0x46   : > { %p718_p1 = scmp.ne.s32.totalorder %s717_s26, 0 }
  0x47   : > { %s656_s29 = sand.u32 (!%p718_p1), 1, %s488_s10   ;;  %p719_p3 = scmp.ne.s32.totalorder (!%p718_p1), %s711_s20, 0 }
  0x48   : > { %154 = sbr.rel (%p718_p1) target bundleno = 105 (0x69), region = 28  ;;  %s314_s5 = sshll.u32 (!%p718_p1), %s656_s29, 1 }
  0x49   : > { %s157_s7 = scalar_lea.sflag (!%p718_p1), [#allocation3], %s656_s29  ;;  %s160_s28 = scalar_lea.vmem (!%p718_p1), [#allocation2], %s314_s5 }
  0x4d   : > { %471 = dma.done.wait (%p719_p3), %s157_s7, 32  }
  0x4e   : > { %473 = vsyncadd (%p719_p3), %s157_s7, 4294967264  ;;  %s166_s3 = scalar_lea.sflag [#allocation6], %s656_s29  ;;  %s168_s26 = scalar_lea.vmem [#allocation5], %s656_s29 }
  0x4f   : > { %475 = dma.done.wait (%p719_p3), %s166_s3, 16  }
  0x50   : > { %477 = vsyncadd (%p719_p3), %s166_s3, 4294967280  ;;  %s192_s6 = scalar_lea.vmem [#allocation7], %s314_s5  ;;  %s318_s14 = sshll.u32 %s537_s13, 5  ;;  %v193_v0 = vld [vmem:[%s160_s28] sm:$0x3] }
  0x51   : > { %s217_s8 = sshll.u32 %s192_s6, 4  ;;  %v316_v1 = vld [vmem:[%s168_s26] ss:$0 sm:$0xff]  ;;  %s215_s16 = scalar_lea.hbm %s707_s2, %s318_s14  ;;  %s218_s8 = int_to_ptr.vmem [resolvable:$true] %s217_s8 }
  0x52   : > { %v201_v2 = vadd.f32 %v316_v1, %v193_v0  ;;  %s204_s17 = scalar_lea.sflag [#allocation4], %s656_s29  ;;  %s428_s19 = scalar_lea.vmem %s218_s8, 32 }
  0x53   : > { %p429_p6 = scmp.ne.s32.totalorder %s218_s8, %s428_s19  ;;  %p720_p13 = scmp.ne.s32.totalorder %s712_s21, 0 }
  0x54   : > { %202 = vst [vmem:[%s192_s6] sm:$0x3] %v201_v2  ;;  %s500_s20 = smov [#allocation7]  }
  0x55   : > { %p430_p7 = pnand %p429_p6, %p720_p13  ;;  %s432_s24 = sshll.u32 %s500_s20, 4  ;;  %s433_s24 = int_to_ptr.vmem [resolvable:$false] %s432_s24 }
  0x56   : > { %s434_s23 = scalar_lea.vmem %s433_s24, 64  ;;  %p435_p10 = scmp.lt.s32.totalorder %s218_s8, %s433_s24 }
  0x57   : > { %p431_p8 = pneg %p430_p7  ;;  %p436_p2 = scmp.lt.s32.totalorder %s434_s23, %s428_s19 }
  0x59   : > { %p437_p4 = por %p436_p2, %p435_p10 }
  0x5b   : > { %p438_p5 = pnand %p437_p4, %p431_p8 }
  0x5d   : > { %441 = shalt.err (!%p438_p5)
}
  0x5e   : > { %s442_s13 = scalar_lea.hbm %s215_s16, 32  ;;  %s446_s29 = scalar_lea.hbm %s707_s2, 64 }
  0x5f   : > { %p443_p9 = scmp.ne.s32.totalorder %s215_s16, %s442_s13  ;;  %p447_p12 = scmp.lt.s32.totalorder %s215_s16, %s707_s2 }
  0x60   : > { %p448_p1 = scmp.lt.s32.totalorder %s446_s29, %s442_s13 }
  0x61   : > { %p444_p0 = pnand %p443_p9, %p720_p13 }
  0x62   : > { %p449_p3 = por %p448_p1, %p447_p12 }
  0x63   : > { %p445_p11 = pneg %p444_p0 }
  0x65   : > { %p450_p6 = pnand %p449_p3, %p445_p11 }
  0x67   : > { %453 = shalt.err (!%p450_p6)
}
  0x68   : > { %325 = dma.vmem_to_hbm [thread:$0]  (%p720_p13), %s218_s8, 32, %s215_s16, %s204_s17  }
  0x69 PF: > { %s229_s28 = sand.u32 1, %s484_s9   ;;  %p721_p7 = scmp.ne.s32.totalorder %s713_s22, 0 }
  0x6a   : > { %p722_p8 = scmp.ge.s32.totalorder %s496_s12, 2  ;;  %s230_s3 = scalar_lea.sflag [#allocation4], %s229_s28 }
  0x6c   : > { %p335_p10 = pnand %p722_p8, %p721_p7 }
  0x6e   : > { %p336_p2 = pneg %p335_p10 }
  0x70   : > { %479 = dma.done.wait (%p336_p2), %s230_s3, 32  }
  0x71   : > { %481 = vsyncadd (%p336_p2), %s230_s3, 4294967264  ;;  %p18_p4 = scmp.ge.s32.totalorder %s541_s15, 4   ;;  %s723_s9 = smov %s488_s10 }
  0x72   : > { %s724_s10 = smov %s492_s11  ;;  %s725_s11 = smov %s553_s18 }
  0x73   : > { %s726_s12 = smov %s541_s15  ;;  %20 = sbr.rel (!%p18_p4) target bundleno = 7 (0x7), region = 86 }
  0x78   :  { %235 = vsyncpa [#allocation3], 1 }
  0x79   :  { %237 = vsyncpa [#allocation3 + $0x1], 1 }
  0x7a   :  { %238 = vsyncpa [#allocation6], 1 }
  0x7b   :  { %240 = vsyncpa [#allocation6 + $0x1], 1 }
  0x7c   :  { %241 = vsyncpa [#allocation4], 1 }
  0x7d   :  { %243 = vsyncpa [#allocation4 + $0x1], 1 }

</bundles_post_ra>
